<compile_context>
chip_gen: v6e
topology: v6e:2x2x1
jax: 0.10.0
libtpu: 0.0.40
codegen_flags: <defaults>
</compile_context>

<pallas_src>
import functools

import jax
import jax.numpy as jnp
from jax import lax
from jax.experimental import pallas as pl
from jax.experimental.pallas import tpu as pltpu

NEG_SLOPE = 0.01  # nn.LeakyReLU() default


def _round_up(x, m):
    return (x + m - 1) // m * m


def _padded_bytes(rows, cols, itemsize):
    # Generous (sublane, lane) padding estimate: rows -> 16, cols -> 128.
    return _round_up(max(rows, 1), 16) * _round_up(max(cols, 1), 128) * itemsize


def _block_bytes(tile_h, Wo, Cin, Cout, in_itemsize=2):
    """Approximate per-grid-step VMEM footprint (double-buffered I/O + acc)."""
    k3 = 3 * Cin
    xe_b = (tile_h + 1) * _padded_bytes(Wo, k3, in_itemsize)   # even plane block
    xo_b = tile_h * _padded_bytes(Wo, k3, in_itemsize)         # odd plane block
    w_b = 3 * _padded_bytes(k3, Cout, in_itemsize)             # weights
    out_b = tile_h * _padded_bytes(Wo, Cout, 4)                # f32 output block
    acc_b = _padded_bytes(tile_h * Wo, Cout, 4)                # f32 accumulator
    return 2 * (xe_b + xo_b + w_b + out_b) + acc_b


def _pick_tile_h(Ho, Wo, Cin, Cout, budget_bytes=12 << 20, max_rows=1024):
    """Largest divisor of Ho with tile_h*Wo <= max_rows and blocks within budget."""
    best = 1
    for th in range(1, Ho + 1):
        if Ho % th:
            continue
        if th * Wo > max_rows:
            continue
        if _block_bytes(th, Wo, Cin, Cout) > budget_bytes:
            continue
        best = th
    return best


def _downsample_kernel(xe_ref, xo_ref, w_ref, y_ref, *, tile_h, Wo, Cin, Cout):
    """One (image, Ho-tile) per grid step.

    xe_ref: (1, tile_h+1, Wo, 3*Cin)  even padded rows for this tile (incl. 1-row halo)
    xo_ref: (1, tile_h,   Wo, 3*Cin)  odd padded rows for this tile
    w_ref : (3, 3*Cin, Cout)          per-kh weight slab, K ordered as (kw, cin)
    y_ref : (1, tile_h, Wo, Cout)     f32 output tile
    """
    k3 = 3 * Cin
    m = tile_h * Wo
    # Three taps (one per kh), each a contiguous leading-row window of the
    # W-im2col planes -> the reshape is a free leading-dim collapse, K = 3*Cin.
    t0 = xe_ref[0, pl.ds(0, tile_h)].reshape(m, k3)   # kh = 0 (padded rows 2*ho)
    t1 = xo_ref[0].reshape(m, k3)                     # kh = 1 (padded rows 2*ho+1)
    t2 = xe_ref[0, pl.ds(1, tile_h)].reshape(m, k3)   # kh = 2 (padded rows 2*ho+2)
    # Consecutive dots into one small f32 accumulator (MXU accumulate / MRB on v7x).
    acc = jnp.dot(t0, w_ref[0], preferred_element_type=jnp.float32)
    acc = acc + jnp.dot(t1, w_ref[1], preferred_element_type=jnp.float32)
    acc = acc + jnp.dot(t2, w_ref[2], preferred_element_type=jnp.float32)
    # Fused LeakyReLU on the f32 accumulator, single store.
    y = jnp.where(acc > 0, acc, NEG_SLOPE * acc)
    y_ref[0] = y.reshape(tile_h, Wo, Cout).astype(y_ref.dtype)


@functools.partial(jax.jit, static_argnames=("compute_dtype",))
def downsample_forward(x_nchw, weight_oihw, compute_dtype=jnp.bfloat16):
    """DownSample forward.

    x_nchw:      (N, C, H, W)  float32
    weight_oihw: (C, C, 3, 3)  float32 (PyTorch Conv2d weight layout, no bias)
    returns:     (N, C, Ho, Wo) float32 with Ho = floor((H-1)/2)+1, Wo likewise.
    """
    N, Cin, H, W = x_nchw.shape
    Cout, Cin_w, KH, KW = weight_oihw.shape
    assert (KH, KW) == (3, 3) and Cin_w == Cin
    Ho = (H + 2 - 3) // 2 + 1
    Wo = (W + 2 - 3) // 2 + 1
    k3 = 3 * Cin
    itm = jnp.dtype(compute_dtype).itemsize

    tile_h = _pick_tile_h(Ho, Wo, Cin, Cout)
    n_t = Ho // tile_h

    # --- wrapper glue (pad / strided slice / concat; fusable XLA ops) ---------
    x = jnp.transpose(x_nchw, (0, 2, 3, 1)).astype(compute_dtype)       # NHWC bf16
    pad_h = 2 * Ho + 1 - H                   # padded H == 2*Ho + 2
    pad_w = 2 * Wo + 1 - W                   # padded W == 2*Wo + 2
    xp = jnp.pad(x, ((0, 0), (1, pad_h), (1, pad_w), (0, 0)))

    # W-only im2col: output column wo carries padded cols 2wo, 2wo+1, 2wo+2
    # contiguously in channels (channel index = kw*Cin + cin).
    xc = jnp.concatenate(
        [xp[:, :, 0:2 * Wo:2, :],
         xp[:, :, 1:2 * Wo + 1:2, :],
         xp[:, :, 2:2 * Wo + 2:2, :]], axis=-1)                          # (N, 2Ho+2, Wo, 3C)

    # Row-parity split: even rows feed kh=0 / kh=2 taps, odd rows feed kh=1.
    xe = xc[:, 0::2]                 # (N, Ho+1, Wo, 3C)  padded rows 2q
    xo = xc[:, 1:2 * Ho:2]           # (N, Ho,   Wo, 3C)  padded rows 2ho+1

    # Pre-tile the even plane with a duplicated 1-row halo per Ho-tile so both
    # even taps are contiguous leading-row windows inside the kernel.
    if n_t == 1:
        xe_t = xe
    else:
        rows = (jnp.arange(n_t)[:, None] * tile_h
                + jnp.arange(tile_h + 1)[None, :]).reshape(-1)
        xe_t = jnp.take(xe, rows, axis=1)
    xe_t = xe_t.reshape(N * n_t, tile_h + 1, Wo, k3)

    # weight (Cout, Cin, kh, kw) -> (kh, kw, Cin, Cout) -> (3, 3*Cin, Cout);
    # the (kw, Cin) flattening matches the plane channel order.
    w = jnp.transpose(weight_oihw, (2, 3, 1, 0)).reshape(3, k3, Cout).astype(compute_dtype)

    kernel = functools.partial(_downsample_kernel,
                               tile_h=tile_h, Wo=Wo, Cin=Cin, Cout=Cout)

    bytes_accessed = (xe_t.size + xo.size + w.size) * itm + N * Ho * Wo * Cout * 4
    vmem_limit = int(min(64 << 20,
                         max(4 << 20,
                             int(_block_bytes(tile_h, Wo, Cin, Cout, itm) * 1.5)
                             + (1 << 20))))

    out = pl.pallas_call(
        kernel,
        out_shape=jax.ShapeDtypeStruct((N, Ho, Wo, Cout), jnp.float32),
        grid_spec=pltpu.PrefetchScalarGridSpec(
            num_scalar_prefetch=0,
            grid=(N, n_t),
            in_specs=[
                pl.BlockSpec((1, tile_h + 1, Wo, k3),
                             lambda n, t: (n * n_t + t, 0, 0, 0)),
                pl.BlockSpec((1, tile_h, Wo, k3),
                             lambda n, t: (n, t, 0, 0)),
                pl.BlockSpec((3, k3, Cout),
                             lambda n, t: (0, 0, 0)),
            ],
            out_specs=pl.BlockSpec((1, tile_h, Wo, Cout),
                                   lambda n, t: (n, t, 0, 0)),
        ),
        compiler_params=pltpu.CompilerParams(
            dimension_semantics=("parallel", "parallel"),
            vmem_limit_bytes=vmem_limit),
        cost_estimate=pl.CostEstimate(
            flops=2 * N * Ho * Wo * 9 * Cin * Cout,
            transcendentals=0,
            bytes_accessed=bytes_accessed),
    )(xe_t, xo, w)

    return jnp.transpose(out, (0, 3, 1, 2))                              # NCHW, f32


def _reference(x_nchw, weight_oihw):
    y = lax.conv_general_dilated(
        x_nchw, weight_oihw,
        window_strides=(2, 2),
        padding=((1, 1), (1, 1)),
        dimension_numbers=("NCHW", "OIHW", "NCHW"),
        precision=lax.Precision.HIGHEST)
    return jnp.where(y > 0, y, NEG_SLOPE * y)


if __name__ == "__main__":
    key = jax.random.PRNGKey(0)
    k_x, k_w = jax.random.split(key)

    N, C, H, W = 2, 4, 16, 16
    x = jax.random.normal(k_x, (N, C, H, W), dtype=jnp.float32)
    # Deterministic synthetic Conv2d weight, shape (out_C, in_C, 3, 3), no bias.
    weight = jax.random.normal(k_w, (C, C, 3, 3), dtype=jnp.float32) * 0.1

    out = jax.block_until_ready(downsample_forward(x, weight))
    assert out.shape == (N, C, H // 2, W // 2), out.shape
    assert out.dtype == jnp.float32

    # Matched-precision check: kernel uses bf16 operands with f32 accumulation,
    # so compare against an f32 reference conv on bf16-rounded inputs.
    x_bf = x.astype(jnp.bfloat16).astype(jnp.float32)
    w_bf = weight.astype(jnp.bfloat16).astype(jnp.float32)
    ref_matched = _reference(x_bf, w_bf)
    assert jnp.allclose(out, ref_matched, atol=1e-3, rtol=1e-3), (
        "mismatch vs matched-precision reference, max abs err = "
        + str(float(jnp.max(jnp.abs(out - ref_matched)))))

    # Loose sanity check against the full-f32 reference (bf16 rounding noise only).
    ref_f32 = _reference(x, weight)
    assert jnp.allclose(out, ref_f32, atol=1e-1, rtol=1e-1), "mismatch vs f32 reference"

    print("KERNEL_OK")
</pallas_src>

<mosaic_0001>
module attributes {stable_mosaic.version = 11 : i64} {
  func.func @_downsample_kernel(%arg0: i32, %arg1: i32, %arg2: memref<1x9x8x12xbf16, #tpu.memory_space<vmem>>, %arg3: memref<1x8x8x12xbf16, #tpu.memory_space<vmem>>, %arg4: memref<3x12x4xbf16, #tpu.memory_space<vmem>>, %arg5: memref<1x8x8x4xf32, #tpu.memory_space<vmem>>) attributes {dimension_semantics = [#tpu.dimension_semantics<parallel>, #tpu.dimension_semantics<parallel>], iteration_bounds = array<i64: 2, 1>, scalar_prefetch = 0 : i64, scratch_operands = 0 : i64, tpu.core_type = #tpu.core_type<tc>, window_params = [{transform_indices = @transform_0, window_bounds = array<i64: 1, 9, 8, 12>}, {transform_indices = @transform_1, window_bounds = array<i64: 1, 8, 8, 12>}, {pipeline_mode = #tpu.pipeline_mode<synchronous>, transform_indices = @transform_2, window_bounds = array<i64: 3, 12, 4>}, {transform_indices = @transform_3, window_bounds = array<i64: 1, 8, 8, 4>}]} {
    %c0 = arith.constant 0 : index
    %c0_0 = arith.constant 0 : index
    %c0_1 = arith.constant 0 : index
    %c0_2 = arith.constant 0 : index
    %0 = vector.load %arg2[%c0, %c0_0, %c0_1, %c0_2] : memref<1x9x8x12xbf16, #tpu.memory_space<vmem>>, vector<1x8x8x12xbf16>
    %1 = vector.shape_cast %0 : vector<1x8x8x12xbf16> to vector<8x8x12xbf16>
    %2 = vector.shape_cast %1 : vector<8x8x12xbf16> to vector<64x12xbf16>
    %c0_3 = arith.constant 0 : index
    %c0_4 = arith.constant 0 : index
    %c0_5 = arith.constant 0 : index
    %c0_6 = arith.constant 0 : index
    %3 = vector.load %arg3[%c0_3, %c0_4, %c0_5, %c0_6] : memref<1x8x8x12xbf16, #tpu.memory_space<vmem>>, vector<1x8x8x12xbf16>
    %4 = vector.shape_cast %3 : vector<1x8x8x12xbf16> to vector<8x8x12xbf16>
    %5 = vector.shape_cast %4 : vector<8x8x12xbf16> to vector<64x12xbf16>
    %c0_7 = arith.constant 0 : index
    %c1 = arith.constant 1 : index
    %c0_8 = arith.constant 0 : index
    %c0_9 = arith.constant 0 : index
    %6 = vector.load %arg2[%c0_7, %c1, %c0_8, %c0_9] : memref<1x9x8x12xbf16, #tpu.memory_space<vmem>>, vector<1x8x8x12xbf16>
    %7 = vector.shape_cast %6 : vector<1x8x8x12xbf16> to vector<8x8x12xbf16>
    %8 = vector.shape_cast %7 : vector<8x8x12xbf16> to vector<64x12xbf16>
    %c0_10 = arith.constant 0 : index
    %c0_11 = arith.constant 0 : index
    %c0_12 = arith.constant 0 : index
    %9 = vector.load %arg4[%c0_10, %c0_11, %c0_12] : memref<3x12x4xbf16, #tpu.memory_space<vmem>>, vector<1x12x4xbf16>
    %10 = vector.shape_cast %9 : vector<1x12x4xbf16> to vector<12x4xbf16>
    %cst = arith.constant dense<0.000000e+00> : vector<64x4xf32>
    %11 = tpu.matmul %2, %10, %cst {dimension_numbers = #tpu.dot_dimension_numbers<[1], [0], [0], [1], [0, 0, 1, 1], [], []>} : vector<64x12xbf16>, vector<12x4xbf16>, vector<64x4xf32> -> vector<64x4xf32>
    %c1_13 = arith.constant 1 : index
    %c0_14 = arith.constant 0 : index
    %c0_15 = arith.constant 0 : index
    %12 = vector.load %arg4[%c1_13, %c0_14, %c0_15] : memref<3x12x4xbf16, #tpu.memory_space<vmem>>, vector<1x12x4xbf16>
    %13 = vector.shape_cast %12 : vector<1x12x4xbf16> to vector<12x4xbf16>
    %cst_16 = arith.constant dense<0.000000e+00> : vector<64x4xf32>
    %14 = tpu.matmul %5, %13, %cst_16 {dimension_numbers = #tpu.dot_dimension_numbers<[1], [0], [0], [1], [0, 0, 1, 1], [], []>} : vector<64x12xbf16>, vector<12x4xbf16>, vector<64x4xf32> -> vector<64x4xf32>
    %15 = arith.addf %11, %14 : vector<64x4xf32>
    %c2 = arith.constant 2 : index
    %c0_17 = arith.constant 0 : index
    %c0_18 = arith.constant 0 : index
    %16 = vector.load %arg4[%c2, %c0_17, %c0_18] : memref<3x12x4xbf16, #tpu.memory_space<vmem>>, vector<1x12x4xbf16>
    %17 = vector.shape_cast %16 : vector<1x12x4xbf16> to vector<12x4xbf16>
    %cst_19 = arith.constant dense<0.000000e+00> : vector<64x4xf32>
    %18 = tpu.matmul %8, %17, %cst_19 {dimension_numbers = #tpu.dot_dimension_numbers<[1], [0], [0], [1], [0, 0, 1, 1], [], []>} : vector<64x12xbf16>, vector<12x4xbf16>, vector<64x4xf32> -> vector<64x4xf32>
    %19 = arith.addf %15, %18 : vector<64x4xf32>
    %cst_20 = arith.constant 0.000000e+00 : f32
    %20 = vector.broadcast %cst_20 : f32 to vector<64x4xf32>
    %21 = arith.cmpf ogt, %19, %20 : vector<64x4xf32>
    %cst_21 = arith.constant 0.00999999977 : f32
    %22 = vector.broadcast %cst_21 : f32 to vector<64x4xf32>
    %23 = arith.mulf %22, %19 : vector<64x4xf32>
    %24 = arith.select %21, %19, %23 : vector<64x4xi1>, vector<64x4xf32>
    %25 = vector.shape_cast %24 : vector<64x4xf32> to vector<8x8x4xf32>
    %c0_22 = arith.constant 0 : index
    %c0_23 = arith.constant 0 : index
    %c0_24 = arith.constant 0 : index
    %c0_25 = arith.constant 0 : index
    %26 = vector.load %arg5[%c0_22, %c0_23, %c0_24, %c0_25] : memref<1x8x8x4xf32, #tpu.memory_space<vmem>>, vector<1x8x8x4xf32>
    %27 = vector.shape_cast %26 : vector<1x8x8x4xf32> to vector<8x8x4xf32>
    %28 = vector.shape_cast %25 : vector<8x8x4xf32> to vector<1x8x8x4xf32>
    tpu.vector_store %arg5[%c0_22, %c0_23, %c0_24, %c0_25], %28 {strides = array<i32>} : memref<1x8x8x4xf32, #tpu.memory_space<vmem>>, vector<1x8x8x4xf32>,
    return
  }
  func.func @transform_0(%arg0: i32, %arg1: i32) -> (i32, i32, i32, i32) {
    %c1_i32 = arith.constant 1 : i32
    %0 = arith.muli %arg0, %c1_i32 : i32
    %1 = arith.addi %0, %arg1 : i32
    %c0_i32 = arith.constant 0 : i32
    %c0_i32_0 = arith.constant 0 : i32
    %c0_i32_1 = arith.constant 0 : i32
    %c0_i32_2 = arith.constant 0 : i32
    return %1, %c0_i32, %c0_i32_0, %c0_i32_1 : i32, i32, i32, i32
  }
  func.func @transform_1(%arg0: i32, %arg1: i32) -> (i32, i32, i32, i32) {
    %c0_i32 = arith.constant 0 : i32
    %c0_i32_0 = arith.constant 0 : i32
    %c0_i32_1 = arith.constant 0 : i32
    return %arg0, %arg1, %c0_i32, %c0_i32_0 : i32, i32, i32, i32
  }
  func.func @transform_2(%arg0: i32, %arg1: i32) -> (i32, i32, i32) {
    %c0_i32 = arith.constant 0 : i32
    %c0_i32_0 = arith.constant 0 : i32
    %c0_i32_1 = arith.constant 0 : i32
    %c0_i32_2 = arith.constant 0 : i32
    return %c0_i32, %c0_i32_0, %c0_i32_1 : i32, i32, i32
  }
  func.func @transform_3(%arg0: i32, %arg1: i32) -> (i32, i32, i32, i32) {
    %c0_i32 = arith.constant 0 : i32
    %c0_i32_0 = arith.constant 0 : i32
    %c0_i32_1 = arith.constant 0 : i32
    return %arg0, %arg1, %c0_i32, %c0_i32_0 : i32, i32, i32, i32
  }
}

</mosaic_0001>

<bundles_post_ra>
// kernel: downsample_forward.1
= control target key start
LH: loop header
LB: loop body
LE: loop exit
PB: predicated region body
PF: predicated region fallthrough
CT: control target
= control target key end

     0   :  { %s916_s12 = smov 0   ;;  %s918_s13 = smov 0   ;;  %s1003_s0 = inlined_call_operand.vmem [shape: bf16[2,9,8,12], index: 0, kind: input, shape index: {}]   ;;  %s1004_s1 = inlined_call_operand.vmem [shape: bf16[2,8,8,12], index: 1, kind: input, shape index: {}]   ;;  %s1005_s2 = inlined_call_operand.vmem [shape: bf16[3,12,4], index: 2, kind: input, shape index: {}]   ;;  %s1006_s3 = inlined_call_operand.vmem [shape: f32[2,8,8,4], index: 3, kind: output, shape index: {}]  }
   0x1   :  { %s920_s14 = smov 0  }
   0x2 LB: > { %s25_s15 = sadd.s32 1, %s890_s13  ;;  %p732_p0 = scmp.ge.s32.totalorder %s894_s14, 1  ;;  %s894_s14 = sphi %s920_s14, %s13_s14   ;;  %s890_s13 = sphi %s918_s13, %s1008_s13   ;;  %s886_s12 = sphi %s916_s12, %s1007_s12  }
   0x3   : > { %p27_p1 = scmp.ge.s32.totalorder %s25_s15, 2  ;;  %p172_p2 = scmp.lt.s32.totalorder %s894_s14, 3 }
   0x5   : > { %s1010_s15 = smov (%p27_p1, %s25_s15), 0  ;;  %p173_p3 = pnand %p732_p0, %p172_p2 }
   0x6   : > { %p211_p4 = scmp.lt.s32.totalorder (!%p173_p3), %s886_s12, 1 }
   0x7   : > { %176 = sbr.rel (%p173_p3) target bundleno = 241 (0xf1), region = 32 }
   0xc   : > { %v857_v0 = vld [vmem:[%s1005_s2 + $0x8] sm:$0x3f]   ;;  %vm306_vm0 = vcmask 1045504   ;;  %v860_v2 = vld [vmem:[%s1005_s2] sm:$0x3f]   ;;  %s1012_s12 = smov (!%p211_p4, %s886_s12), 1 }
   0xd   : > { %829 = vmatprep.subr.msk.bf16.mxu1 %vm306_vm0, %v857_v0  ;;  %828 = vmatprep.subr.msk.bf16.mxu0 %vm306_vm0, %v857_v0  ;;  %v308_v1 = vsel %vm306_vm0, %v857_v0, 0  ;;  %v863_v3 = vld [vmem:[%s1005_s2 + $0x10] sm:$0x3f]   ;;  %s832_s22 = smul.u32 36, %s1012_s12  ;;  %s779_s23 = sshll.u32 %s1012_s12, 5  ;;  %vm293_vm1 = vcmask 97280  }
   0xe   : > { %827 = vmatpush3.bf16.msra.mxu1 %v308_v1  ;;  %797 = vmatpush3.bf16.msra.mxu0 %v308_v1  ;;  %s225_s26 = scalar_lea.vmem %s1004_s1, %s779_s23  ;;  %v521_v7 = vsel %vm306_vm0, %v863_v3, 0  ;;  %v413_v9 = vsel %vm306_vm0, %v860_v2, 0  ;;  %s780_s30 = sshll.u32 %s1012_s12, 6  ;;  %vm620_vm2 = vcmask 31744  }
   0xf   : > { %830 = vmatprep.subr.msk.bf16.mxu1 %vm306_vm0, %v860_v2  ;;  %831 = vmatprep.subr.msk.bf16.mxu0 %vm306_vm0, %v863_v3  ;;  %v858_v4 = vld [vmem:[%s225_s26] sm:$0xff]   ;;  %s215_s29 = scalar_lea.vmem %s1003_s0, %s832_s22  ;;  %v859_v5 = vld [vmem:[%s225_s26 + $0x10] sm:$0xff]   ;;  %v861_v6 = vld [vmem:[%s225_s26 + $0x8] sm:$0xff]   ;;  %s976_s6 = scalar_lea.vmem %s1006_s3, %s780_s30 }
  0x10   : > { %798 = vmatprep.mubr.msk.bf16.mxu0 %vm293_vm1, %v858_v4  ;;  %802 = vmatprep.mubr.msk.bf16.mxu1 %vm293_vm1, %v859_v5  ;;  %v862_v8 = vld [vmem:[%s225_s26 + $0x18] sm:$0xff]   ;;  %v864_v10 = vld [vmem:[%s215_s29] sm:$0xff]   ;;  %v866_v12 = vld [vmem:[%s215_s29 + $0x8] sm:$0xff]  }
  0x11   : > { %799 = vmatmul.mubr.msk.bf16.vlgmr.msra.gmra.mxu0 %vm293_vm1, %v861_v6  ;;  %803 = vmatmul.mubr.msk.bf16.vlgmr.msra.gmra.mxu1 %vm293_vm1, %v862_v8  ;;  %v865_v11 = vld [vmem:[%s215_s29 + $0x4] sm:$0xff]   ;;  %v867_v13 = vld [vmem:[%s215_s29 + $0xc] sm:$0xff]   ;;  %v869_v14 = vld [vmem:[%s215_s29 + $0x14] sm:$0xff]  }
  0x12   : > { %817 = vmatpush3.bf16.msra.mxu0 %v521_v7  ;;  %807 = vmatpush3.bf16.msra.mxu1 %v413_v9  ;;  %v868_v15 = vld [vmem:[%s215_s29 + $0x10] sm:$0xff]   ;;  %v871_v16 = vld [vmem:[%s215_s29 + $0x1c] sm:$0xff]  }
  0x13   : > { %808 = vmatprep.mubr.msk.bf16.mxu1 %vm293_vm1, %v864_v10  ;;  %818 = vmatprep.mubr.msk.bf16.mxu0 %vm293_vm1, %v865_v11  ;;  %v870_v17 = vld [vmem:[%s215_s29 + $0x18] sm:$0xff]  }
  0x19   : > { %819 = vmatmul.mubr.msk.bf16.vlgmr.msra.gmra.mxu0 %vm293_vm1, %v867_v13  ;;  %809 = vmatmul.mubr.msk.bf16.vlgmr.msra.gmra.mxu1 %vm293_vm1, %v866_v12 }
  0x1a   : > { %822 = vmatprep.mubr.msk.bf16.mxu0 %vm293_vm1, %v869_v14  ;;  %812 = vmatprep.mubr.msk.bf16.mxu1 %vm293_vm1, %v868_v15 }
  0x21   : > { %823 = vmatmul.mubr.msk.bf16.gmra.mxu0 %vm293_vm1, %v871_v16  ;;  %813 = vmatmul.mubr.msk.bf16.gmra.mxu1 %vm293_vm1, %v870_v17 }
  0xd1   : > { %v800_v18 = vpop.f32.mrf.mxu0  ;;  %v804_v19 = vpop.f32.mrf.mxu1 }
  0xd3   : > { %v344_v20 = vpop.f32.mrf.mxu0  ;;  %v360_v21 = vpop.f32.mrf.mxu1 }
  0xd5   : > { %v801_v22 = vpop.f32.mrf.mxu0  ;;  %v805_v23 = vpop.f32.mrf.mxu1 }
  0xd7   : > { %v347_v24 = vpop.f32.mrf.mxu0  ;;  %v363_v25 = vpop.f32.mrf.mxu1 }
  0xd9   : > { %v820_v26 = vpop.f32.mrf.mxu0  ;;  %v810_v27 = vpop.f32.mrf.mxu1 }
  0xda   : > { %v458_v28 = vadd.f32 %v810_v27, %v800_v18 }
  0xdb   : > { %v557_v29 = vpop.f32.mrf.mxu0  ;;  %v449_v30 = vpop.f32.mrf.mxu1 }
  0xdc   : > { %v590_v31 = vadd.f32 %v820_v26, %v458_v28  ;;  %v450_v32 = vadd.f32 %v449_v30, %v344_v20 }
  0xdd   : > { %v821_v33 = vpop.f32.mrf.mxu0  ;;  %v811_v34 = vpop.f32.mrf.mxu1 }
  0xde   : > { %vm598_vm3 = vcmp.gt.f32.partialorder %v590_v31, 0.0  ;;  %v606_v35 = vmul.f32 0.01, %v590_v31  ;;  %v588_v36 = vadd.f32 %v557_v29, %v450_v32  ;;  %v461_v37 = vadd.f32 %v811_v34, %v801_v22 }
  0xdf   : > { %v560_v38 = vpop.f32.mrf.mxu0  ;;  %v452_v39 = vpop.f32.mrf.mxu1 }
  0xe0   : > { %v614_v40 = vsel %vm598_vm3, %v590_v31, %v606_v35  ;;  %vm596_vm4 = vcmp.gt.f32.partialorder %v588_v36, 0.0  ;;  %v604_v41 = vmul.f32 0.01, %v588_v36  ;;  %v591_v42 = vadd.f32 %v821_v33, %v461_v37 }
  0xe1   : > { %v824_v43 = vpop.f32.mrf.mxu0  ;;  %623 = vst.msk [vmem:[%s976_s6 + $0x10] sm:$0xff] %vm620_vm2, %v614_v40  ;;  %v453_v44 = vadd.f32 %v452_v39, %v347_v24  ;;  %v814_v45 = vpop.f32.mrf.mxu1 }
  0xe2   : > { %v612_v46 = vsel %vm596_vm4, %v588_v36, %v604_v41  ;;  %vm599_vm5 = vcmp.gt.f32.partialorder %v591_v42, 0.0  ;;  %v607_v47 = vmul.f32 0.01, %v591_v42  ;;  %v474_v48 = vadd.f32 %v814_v45, %v804_v19 }
  0xe3   : > { %v573_v49 = vpop.f32.mrf.mxu0  ;;  %621 = vst.msk [vmem:[%s976_s6] sm:$0xff] %vm620_vm2, %v612_v46  ;;  %v589_v50 = vadd.f32 %v560_v38, %v453_v44  ;;  %v465_v51 = vpop.f32.mrf.mxu1 }
  0xe4   : > { %v615_v52 = vsel %vm599_vm5, %v591_v42, %v607_v47  ;;  %v594_v53 = vadd.f32 %v824_v43, %v474_v48  ;;  %v466_v54 = vadd.f32 %v465_v51, %v360_v21 }
  0xe5   : > { %624 = vst.msk [vmem:[%s976_s6 + $0x18] sm:$0xff] %vm620_vm2, %v615_v52  ;;  %vm597_vm6 = vcmp.gt.f32.partialorder %v589_v50, 0.0  ;;  %v605_v55 = vmul.f32 0.01, %v589_v50  ;;  %v815_v56 = vpop.f32.mrf.mxu1  ;;  %v825_v60 = vpop.f32.mrf.mxu0 }
  0xe6   : > { %vm602_vm7 = vcmp.gt.f32.partialorder %v594_v53, 0.0  ;;  %v610_v57 = vmul.f32 0.01, %v594_v53  ;;  %v592_v58 = vadd.f32 %v573_v49, %v466_v54  ;;  %v477_v59 = vadd.f32 %v815_v56, %v805_v23 }
  0xe7   : > { %v613_v61 = vsel %vm597_vm6, %v589_v50, %v605_v55  ;;  %v468_v62 = vpop.f32.mrf.mxu1  ;;  %v576_v5 = vpop.f32.mrf.mxu0 }
  0xe8   : > { %622 = vst.msk [vmem:[%s976_s6 + $0x8] sm:$0xff] %vm620_vm2, %v613_v61  ;;  %v618_v63 = vsel %vm602_vm7, %v594_v53, %v610_v57  ;;  %vm600_vm8 = vcmp.gt.f32.partialorder %v592_v58, 0.0  ;;  %v608_v0 = vmul.f32 0.01, %v592_v58  ;;  %v595_v1 = vadd.f32 %v825_v60, %v477_v59 }
  0xe9   : > { %627 = vst.msk [vmem:[%s976_s6 + $0x30] sm:$0xff] %vm620_vm2, %v618_v63  ;;  %v469_v2 = vadd.f32 %v468_v62, %v363_v25 }
  0xea   : > { %v616_v3 = vsel %vm600_vm8, %v592_v58, %v608_v0  ;;  %vm603_vm9 = vcmp.gt.f32.partialorder %v595_v1, 0.0  ;;  %v611_v4 = vmul.f32 0.01, %v595_v1 }
  0xeb   : > { %625 = vst.msk [vmem:[%s976_s6 + $0x20] sm:$0xff] %vm620_vm2, %v616_v3  ;;  %v593_v6 = vadd.f32 %v576_v5, %v469_v2 }
  0xec   : > { %v619_v7 = vsel %vm603_vm9, %v595_v1, %v611_v4 }
  0xed   : > { %628 = vst.msk [vmem:[%s976_s6 + $0x38] sm:$0xff] %vm620_vm2, %v619_v7  ;;  %vm601_vm10 = vcmp.gt.f32.partialorder %v593_v6, 0.0  ;;  %v609_v8 = vmul.f32 0.01, %v593_v6 }
  0xef   : > { %v617_v9 = vsel %vm601_vm10, %v593_v6, %v609_v8 }
  0xf0   : > { %626 = vst.msk [vmem:[%s976_s6 + $0x28] sm:$0xff] %vm620_vm2, %v617_v9 }
  0xf1 PF: > { %s13_s14 = sadd.s32 1, %s894_s14   ;;  %s1007_s12 = smov %s890_s13 }
  0xf2   : > { %p10_p5 = scmp.ge.s32.totalorder %s13_s14, 4   ;;  %s1008_s13 = smov %s1010_s15 }
  0xf4   :  { %12 = sbr.rel (!%p10_p5) target bundleno = 2 (0x2), region = 68 }

</bundles_post_ra>
